<compile_context>
chip_gen: v5e
topology: v5e:2x2
jax: 0.10.0
libtpu: 0.0.40
codegen_flags: <defaults>
</compile_context>

<pallas_src>
import functools

import jax
import jax.numpy as jnp
from jax.experimental import pallas as pl
from jax.experimental.pallas import tpu as pltpu

LEAKY_SLOPE = 0.01   # nn.LeakyReLU() default negative_slope
BN_EPS = 1e-5        # nn.BatchNorm1d default eps
LANE = 128
SUBLANE = 8


def _round_up(x, m):
    return (x + m - 1) // m * m


# ----------------------------------------------------------------------------
# Kernel: whole Linear(+folded BN)+LeakyReLU chain + output Linear, fused.
# ----------------------------------------------------------------------------
def _decoder_kernel(num_hidden, *refs):
    """refs = (z_ref, w0, b0, w1, b1, ..., wL, bL, o_ref)."""
    z_ref = refs[0]
    o_ref = refs[-1]
    wb = refs[1:-1]

    h = z_ref[...].astype(jnp.float32)
    num_layers = num_hidden + 1
    for l in range(num_layers):
        w = wb[2 * l][...]          # bf16 (d_in_pad, d_out_pad), BN pre-folded
        b = wb[2 * l + 1][...]      # f32  (1, d_out_pad)
        # bf16 inputs to the MXU, f32 accumulation; bias add in f32.
        h = jnp.dot(h.astype(w.dtype), w,
                    preferred_element_type=jnp.float32) + b
        if l < num_hidden:
            # LeakyReLU (slope < 1 so max(h, slope*h) == leaky_relu(h)).
            # Eval-mode Dropout is the identity.
            h = jnp.maximum(h, LEAKY_SLOPE * h)
    o_ref[...] = h.astype(o_ref.dtype)


# ----------------------------------------------------------------------------
# One-time param preparation: fold eval BN, pad lanes to 128, cast to bf16.
# ----------------------------------------------------------------------------
def prepare_decoder_params(params, compute_dtype=jnp.bfloat16):
    ws, bs = [], []
    for layer in params["hidden"]:
        scale = layer["gamma"] * jax.lax.rsqrt(layer["running_var"] + BN_EPS)
        ws.append(layer["w"] * scale)
        bs.append((layer["b"] - layer["running_mean"]) * scale + layer["beta"])
    ws.append(params["out"]["w"])
    bs.append(params["out"]["b"])

    padded_ws, padded_bs = [], []
    for w, b in zip(ws, bs):
        d_in, d_out = w.shape
        d_in_p, d_out_p = _round_up(d_in, LANE), _round_up(d_out, LANE)
        w_p = jnp.zeros((d_in_p, d_out_p), compute_dtype)
        w_p = w_p.at[:d_in, :d_out].set(w.astype(compute_dtype))
        b_p = jnp.zeros((1, d_out_p), jnp.float32)
        b_p = b_p.at[:, :d_out].set(jnp.reshape(b, (1, -1)).astype(jnp.float32))
        padded_ws.append(w_p)
        padded_bs.append(b_p)

    return {
        "ws": padded_ws,
        "bs": padded_bs,
        "num_hidden": len(params["hidden"]),
        "latent_dim": ws[0].shape[0],
        "output_dim": ws[-1].shape[1],
    }


def _pick_tile_b(batch_pad):
    """Largest tile (multiple of 8) dividing the padded batch, capped at 1024."""
    for cand in (1024, 512, 256, 128, 64, 32, 16, 8):
        if batch_pad % cand == 0:
            return cand
    return batch_pad


def _resident_spec(shape):
    """BlockSpec for a block that stays resident across the whole grid."""
    try:
        # Constant index_map -> never re-fetched; single buffer halves VMEM.
        return pl.BlockSpec(shape, lambda i: (0, 0), pipeline_mode=pl.Buffered(1))
    except (TypeError, AttributeError):
        return pl.BlockSpec(shape, lambda i: (0, 0))


# ----------------------------------------------------------------------------
# Wrapper
# ----------------------------------------------------------------------------
def decoder_forward(z, prepared, *, tile_b=None):
    """z: (B, latent_dim) float32 -> (B, output_dim) float32 (eval mode)."""
    B, D0 = z.shape
    ws, bs = prepared["ws"], prepared["bs"]
    num_hidden = prepared["num_hidden"]
    assert D0 == prepared["latent_dim"], (D0, prepared["latent_dim"])

    d0_pad = ws[0].shape[0]
    d_out = prepared["output_dim"]
    d_out_pad = ws[-1].shape[1]

    # Pad batch (sublane) and latent (lane) dims; padding columns are zero and
    # padded weight rows/cols are zero, so padding stays exactly zero through
    # every layer.
    b_pad = _round_up(B, SUBLANE)
    z_p = jnp.zeros((b_pad, d0_pad), jnp.float32)
    z_p = z_p.at[:B, :D0].set(z.astype(jnp.float32))

    if tile_b is None:
        tile_b = _pick_tile_b(b_pad)
    grid = (b_pad // tile_b,)

    # ---- BlockSpecs: batch-tiled activations, resident (single-buffered) weights
    in_specs = [pl.BlockSpec((tile_b, d0_pad), lambda i: (i, 0))]
    flat_args = [z_p]
    for w, b in zip(ws, bs):
        in_specs.append(_resident_spec(w.shape))
        in_specs.append(_resident_spec(b.shape))
        flat_args.append(w)
        flat_args.append(b)
    out_specs = pl.BlockSpec((tile_b, d_out_pad), lambda i: (i, 0))

    # ---- cost estimate + explicit VMEM budget ----
    flops = 0
    bytes_accessed = z_p.size * 4 + b_pad * d_out_pad * 4
    weight_bytes = 0
    for w, b in zip(ws, bs):
        d_in, d_o = w.shape
        flops += 2 * b_pad * d_in * d_o
        weight_bytes += w.size * w.dtype.itemsize + b.size * b.dtype.itemsize
    bytes_accessed += weight_bytes

    max_width = max(w.shape[1] for w in ws)
    act_bytes = (2 * tile_b * (d0_pad + d_out_pad) * 4      # double-buffered in/out tiles
                 + 2 * tile_b * max_width * 4)               # live intermediates
    # Single-buffered weights + activation tiles + headroom; capped at v7x's
    # 64 MiB physical VMEM so the same setting is safe on all generations.
    vmem_limit = int(min(max(2 * (weight_bytes + act_bytes), 16 << 20), 64 << 20))

    kernel = functools.partial(_decoder_kernel, num_hidden)

    out_p = pl.pallas_call(
        kernel,
        out_shape=jax.ShapeDtypeStruct((b_pad, d_out_pad), jnp.float32),
        grid=grid,
        in_specs=in_specs,
        out_specs=out_specs,
        compiler_params=pltpu.CompilerParams(
            dimension_semantics=("parallel",),
            vmem_limit_bytes=vmem_limit),
        cost_estimate=pl.CostEstimate(
            flops=int(flops), transcendentals=0,
            bytes_accessed=int(bytes_accessed)),
    )(*flat_args)

    return out_p[:B, :d_out]


# ----------------------------------------------------------------------------
# Synthetic params + plain-JAX reference (matches the PyTorch Decoder, eval)
# ----------------------------------------------------------------------------
def init_params(key, dim_list):
    """Linear weights stored pre-transposed as (d_in, d_out); BN stats randomized."""
    hidden = []
    keys = jax.random.split(key, len(dim_list) + 1)
    for idx, (d_in, d_out) in enumerate(dim_list[:-1]):
        k1, k2, k3, k4, k5, k6 = jax.random.split(keys[idx], 6)
        bound = 1.0 / float(jnp.sqrt(d_in))
        hidden.append({
            "w": jax.random.uniform(k1, (d_in, d_out), jnp.float32, -bound, bound),
            "b": jax.random.uniform(k2, (1, d_out), jnp.float32, -bound, bound),
            "gamma": 1.0 + 0.1 * jax.random.normal(k3, (1, d_out), jnp.float32),
            "beta": 0.1 * jax.random.normal(k4, (1, d_out), jnp.float32),
            "running_mean": 0.1 * jax.random.normal(k5, (1, d_out), jnp.float32),
            "running_var": jnp.abs(jax.random.normal(k6, (1, d_out), jnp.float32)) + 0.5,
        })
    d_in, d_out = dim_list[-1]
    k1, k2 = jax.random.split(keys[-1], 2)
    bound = 1.0 / float(jnp.sqrt(d_in))
    out = {
        "w": jax.random.uniform(k1, (d_in, d_out), jnp.float32, -bound, bound),
        "b": jax.random.uniform(k2, (1, d_out), jnp.float32, -bound, bound),
    }
    return {"hidden": hidden, "out": out}


def decoder_ref(z, params):
    """Plain-JAX f32 reference with un-folded BN (validates fold + kernel)."""
    h = z
    for layer in params["hidden"]:
        h = h @ layer["w"] + layer["b"]
        h = (h - layer["running_mean"]) * jax.lax.rsqrt(
            layer["running_var"] + BN_EPS) * layer["gamma"] + layer["beta"]
        h = jnp.where(h >= 0.0, h, LEAKY_SLOPE * h)
    return h @ params["out"]["w"] + params["out"]["b"]


if __name__ == "__main__":
    # Decoder(dim_list=[(8, 32), (32, 64), (64, 16)]) equivalent, eval mode.
    DIM_LIST = [(8, 32), (32, 64), (64, 16)]
    B = 16

    key = jax.random.PRNGKey(0)
    kz, kp = jax.random.split(key)
    z = jax.random.normal(kz, (B, DIM_LIST[0][0]), jnp.float32)
    params = init_params(kp, DIM_LIST)

    prepared = prepare_decoder_params(params)        # fold BN + pad + bf16, once
    out = decoder_forward(z, prepared)
    jax.block_until_ready(out)

    ref = decoder_ref(z, params)
    assert out.shape == (B, DIM_LIST[-1][1]), out.shape
    # bf16 weights/activations in the matmuls -> looser tolerance vs f32 reference.
    assert jnp.allclose(out, ref, atol=5e-2, rtol=5e-2), (
        float(jnp.max(jnp.abs(out - ref))))

    print("KERNEL_OK")
</pallas_src>

<mosaic_0001>
module attributes {stable_mosaic.version = 11 : i64} {
  func.func @_decoder_kernel(%arg0: i32, %arg1: memref<16x128xf32, #tpu.memory_space<vmem>>, %arg2: memref<128x128xbf16, #tpu.memory_space<vmem>>, %arg3: memref<1x128xf32, #tpu.memory_space<vmem>>, %arg4: memref<128x128xbf16, #tpu.memory_space<vmem>>, %arg5: memref<1x128xf32, #tpu.memory_space<vmem>>, %arg6: memref<128x128xbf16, #tpu.memory_space<vmem>>, %arg7: memref<1x128xf32, #tpu.memory_space<vmem>>, %arg8: memref<16x128xf32, #tpu.memory_space<vmem>>) attributes {dimension_semantics = [#tpu.dimension_semantics<parallel>], iteration_bounds = array<i64: 1>, scalar_prefetch = 0 : i64, scratch_operands = 0 : i64, tpu.core_type = #tpu.core_type<tc>, window_params = [{transform_indices = @transform_0, window_bounds = array<i64: 16, 128>}, {pipeline_mode = #tpu.pipeline_mode<synchronous>, transform_indices = @transform_1, window_bounds = array<i64: 128, 128>}, {pipeline_mode = #tpu.pipeline_mode<synchronous>, transform_indices = @transform_2, window_bounds = array<i64: 1, 128>}, {pipeline_mode = #tpu.pipeline_mode<synchronous>, transform_indices = @transform_3, window_bounds = array<i64: 128, 128>}, {pipeline_mode = #tpu.pipeline_mode<synchronous>, transform_indices = @transform_4, window_bounds = array<i64: 1, 128>}, {pipeline_mode = #tpu.pipeline_mode<synchronous>, transform_indices = @transform_5, window_bounds = array<i64: 128, 128>}, {pipeline_mode = #tpu.pipeline_mode<synchronous>, transform_indices = @transform_6, window_bounds = array<i64: 1, 128>}, {transform_indices = @transform_7, window_bounds = array<i64: 16, 128>}]} {
    %c0 = arith.constant 0 : index
    %c0_0 = arith.constant 0 : index
    %0 = vector.load %arg1[%c0, %c0_0] : memref<16x128xf32, #tpu.memory_space<vmem>>, vector<16x128xf32>
    %c0_1 = arith.constant 0 : index
    %c0_2 = arith.constant 0 : index
    %1 = vector.load %arg2[%c0_1, %c0_2] : memref<128x128xbf16, #tpu.memory_space<vmem>>, vector<128x128xbf16>
    %c0_3 = arith.constant 0 : index
    %c0_4 = arith.constant 0 : index
    %2 = vector.load %arg3[%c0_3, %c0_4] : memref<1x128xf32, #tpu.memory_space<vmem>>, vector<1x128xf32>
    %3 = arith.truncf %0 : vector<16x128xf32> to vector<16x128xbf16>
    %cst = arith.constant dense<0.000000e+00> : vector<16x128xf32>
    %4 = tpu.matmul %3, %1, %cst {dimension_numbers = #tpu.dot_dimension_numbers<[1], [0], [0], [1], [0, 0, 1, 1], [], []>} : vector<16x128xbf16>, vector<128x128xbf16>, vector<16x128xf32> -> vector<16x128xf32>
    %5 = vector.broadcast %2 : vector<1x128xf32> to vector<16x128xf32>
    %6 = arith.addf %4, %5 : vector<16x128xf32>
    %cst_5 = arith.constant 0.00999999977 : f32
    %7 = vector.broadcast %cst_5 : f32 to vector<16x128xf32>
    %8 = arith.mulf %7, %6 : vector<16x128xf32>
    %9 = arith.maximumf %6, %8 : vector<16x128xf32>
    %c0_6 = arith.constant 0 : index
    %c0_7 = arith.constant 0 : index
    %10 = vector.load %arg4[%c0_6, %c0_7] : memref<128x128xbf16, #tpu.memory_space<vmem>>, vector<128x128xbf16>
    %c0_8 = arith.constant 0 : index
    %c0_9 = arith.constant 0 : index
    %11 = vector.load %arg5[%c0_8, %c0_9] : memref<1x128xf32, #tpu.memory_space<vmem>>, vector<1x128xf32>
    %12 = arith.truncf %9 : vector<16x128xf32> to vector<16x128xbf16>
    %cst_10 = arith.constant dense<0.000000e+00> : vector<16x128xf32>
    %13 = tpu.matmul %12, %10, %cst_10 {dimension_numbers = #tpu.dot_dimension_numbers<[1], [0], [0], [1], [0, 0, 1, 1], [], []>} : vector<16x128xbf16>, vector<128x128xbf16>, vector<16x128xf32> -> vector<16x128xf32>
    %14 = vector.broadcast %11 : vector<1x128xf32> to vector<16x128xf32>
    %15 = arith.addf %13, %14 : vector<16x128xf32>
    %cst_11 = arith.constant 0.00999999977 : f32
    %16 = vector.broadcast %cst_11 : f32 to vector<16x128xf32>
    %17 = arith.mulf %16, %15 : vector<16x128xf32>
    %18 = arith.maximumf %15, %17 : vector<16x128xf32>
    %c0_12 = arith.constant 0 : index
    %c0_13 = arith.constant 0 : index
    %19 = vector.load %arg6[%c0_12, %c0_13] : memref<128x128xbf16, #tpu.memory_space<vmem>>, vector<128x128xbf16>
    %c0_14 = arith.constant 0 : index
    %c0_15 = arith.constant 0 : index
    %20 = vector.load %arg7[%c0_14, %c0_15] : memref<1x128xf32, #tpu.memory_space<vmem>>, vector<1x128xf32>
    %21 = arith.truncf %18 : vector<16x128xf32> to vector<16x128xbf16>
    %cst_16 = arith.constant dense<0.000000e+00> : vector<16x128xf32>
    %22 = tpu.matmul %21, %19, %cst_16 {dimension_numbers = #tpu.dot_dimension_numbers<[1], [0], [0], [1], [0, 0, 1, 1], [], []>} : vector<16x128xbf16>, vector<128x128xbf16>, vector<16x128xf32> -> vector<16x128xf32>
    %23 = vector.broadcast %20 : vector<1x128xf32> to vector<16x128xf32>
    %24 = arith.addf %22, %23 : vector<16x128xf32>
    %c0_17 = arith.constant 0 : index
    %c0_18 = arith.constant 0 : index
    %25 = vector.load %arg8[%c0_17, %c0_18] : memref<16x128xf32, #tpu.memory_space<vmem>>, vector<16x128xf32>
    tpu.vector_store %arg8[%c0_17, %c0_18], %24 {strides = array<i32>} : memref<16x128xf32, #tpu.memory_space<vmem>>, vector<16x128xf32>,
    return
  }
  func.func @transform_0(%arg0: i32) -> (i32, i32) {
    %c0_i32 = arith.constant 0 : i32
    %c0_i32_0 = arith.constant 0 : i32
    return %arg0, %c0_i32 : i32, i32
  }
  func.func @transform_1(%arg0: i32) -> (i32, i32) {
    %c0_i32 = arith.constant 0 : i32
    %c0_i32_0 = arith.constant 0 : i32
    %c0_i32_1 = arith.constant 0 : i32
    return %c0_i32, %c0_i32_0 : i32, i32
  }
  func.func @transform_2(%arg0: i32) -> (i32, i32) {
    %c0_i32 = arith.constant 0 : i32
    %c0_i32_0 = arith.constant 0 : i32
    %c0_i32_1 = arith.constant 0 : i32
    return %c0_i32, %c0_i32_0 : i32, i32
  }
  func.func @transform_3(%arg0: i32) -> (i32, i32) {
    %c0_i32 = arith.constant 0 : i32
    %c0_i32_0 = arith.constant 0 : i32
    %c0_i32_1 = arith.constant 0 : i32
    return %c0_i32, %c0_i32_0 : i32, i32
  }
  func.func @transform_4(%arg0: i32) -> (i32, i32) {
    %c0_i32 = arith.constant 0 : i32
    %c0_i32_0 = arith.constant 0 : i32
    %c0_i32_1 = arith.constant 0 : i32
    return %c0_i32, %c0_i32_0 : i32, i32
  }
  func.func @transform_5(%arg0: i32) -> (i32, i32) {
    %c0_i32 = arith.constant 0 : i32
    %c0_i32_0 = arith.constant 0 : i32
    %c0_i32_1 = arith.constant 0 : i32
    return %c0_i32, %c0_i32_0 : i32, i32
  }
  func.func @transform_6(%arg0: i32) -> (i32, i32) {
    %c0_i32 = arith.constant 0 : i32
    %c0_i32_0 = arith.constant 0 : i32
    %c0_i32_1 = arith.constant 0 : i32
    return %c0_i32, %c0_i32_0 : i32, i32
  }
  func.func @transform_7(%arg0: i32) -> (i32, i32) {
    %c0_i32 = arith.constant 0 : i32
    %c0_i32_0 = arith.constant 0 : i32
    return %arg0, %c0_i32 : i32, i32
  }
}

</mosaic_0001>

<bundles_post_ra>
// kernel: tpu_custom_call.1
= control target key start
LH: loop header
LB: loop body
LE: loop exit
PB: predicated region body
PF: predicated region fallthrough
CT: control target
= control target key end

     0   :  { %12 = vsyncpa [#allocation3], 0  ;;  %s711_s0 = inlined_call_operand.hbm [shape: f32[16,128], index: 0, kind: input, shape index: {}]   ;;  %s712_s1 = inlined_call_operand.hbm [shape: bf16[128,128], index: 1, kind: input, shape index: {}]   ;;  %s713_s2 = inlined_call_operand.vmem [shape: f32[1,128], index: 2, kind: input, shape index: {}]   ;;  %s714_s3 = inlined_call_operand.hbm [shape: bf16[128,128], index: 3, kind: input, shape index: {}]   ;;  %s715_s4 = inlined_call_operand.vmem [shape: f32[1,128], index: 4, kind: input, shape index: {}]   ;;  %s716_s5 = inlined_call_operand.hbm [shape: bf16[128,128], index: 5, kind: input, shape index: {}]   ;;  %s717_s6 = inlined_call_operand.vmem [shape: f32[1,128], index: 6, kind: input, shape index: {}]   ;;  %s718_s7 = inlined_call_operand.hbm [shape: f32[16,128], index: 7, kind: output, shape index: {}]  }
   0x1   :  { %13 = vsyncpa [#allocation6], 0 }
   0x2   :  { %14 = vsyncpa [#allocation9], 0  ;;  %s33_s26 = sshll.u32 %s712_s1, 4  ;;  %s34_s26 = int_to_ptr.hbm [resolvable:$true] %s33_s26 }
   0x3   :  { %15 = vsyncpa [#allocation4], 0  ;;  %s632_s27 = smov [#allocation5]   ;;  %s20_s8 = sshll.u32 %s711_s0, 4  ;;  %s21_s8 = int_to_ptr.hbm [resolvable:$true] %s20_s8 }
   0x4   :  { %s35_s28 = sshll.u32 %s632_s27, 4  ;;  %s633_s9 = smov 64   ;;  %s36_s28 = int_to_ptr.vmem [resolvable:$true] %s35_s28 }
   0x5   :  { %s634_s10 = smov 4   ;;  %s635_s11 = smov [#allocation2]  }
   0x6   :  { %41 = dma.hbm_to_vmem [thread:$0]  %s34_s26, 1024, %s36_s28, [#allocation6], %s633_s9, %s633_s9, %s634_s10  }
   0x7   :  { %s22_s12 = sshll.u32 %s635_s11, 4  ;;  %s636_s13 = smov 128   ;;  %s23_s12 = int_to_ptr.vmem [resolvable:$true] %s22_s12 }
   0x8   :  { %s637_s14 = smov 8   ;;  %s48_s16 = sshll.u32 %s714_s3, 4  ;;  %s49_s16 = int_to_ptr.hbm [resolvable:$true] %s48_s16 }
   0x9   :  { %28 = dma.hbm_to_vmem [thread:$0]  %s21_s8, 256, %s23_s12, [#allocation3], %s636_s13, %s636_s13, %s637_s14  }
   0xa   :  { %s638_s17 = smov [#allocation7]   ;;  %s63_s20 = sshll.u32 %s716_s5, 4  ;;  %s64_s20 = int_to_ptr.hbm [resolvable:$true] %s63_s20 }
   0xb   :  { %s50_s0 = sshll.u32 %s638_s17, 4  ;;  %s639_s21 = smov [#allocation8]   ;;  %s51_s0 = int_to_ptr.vmem [resolvable:$true] %s50_s0 }
   0xc   :  { %56 = dma.hbm_to_vmem [thread:$0]  %s49_s16, 1024, %s51_s0, [#allocation6], %s633_s9, %s633_s9, %s634_s10  }
   0xd   :  { %s65_s22 = sshll.u32 %s639_s21, 4  ;;  %s66_s22 = int_to_ptr.vmem [resolvable:$true] %s65_s22 }
   0xe   :  { %71 = dma.hbm_to_vmem [thread:$0]  %s64_s20, 1024, %s66_s22, [#allocation9], %s633_s9, %s633_s9, %s634_s10  }
   0xf   :  { %624 = dma.done.wait [#allocation3], 256  }
  0x10   :  { %625 = vsyncadd [#allocation3], 4294967040 }
  0x11   :  { %626 = dma.done.wait [#allocation6], 2048  }
  0x12   :  { %627 = vsyncadd [#allocation6], 4294965248 }
  0x13   :  { %628 = dma.done.wait [#allocation9], 1024  }
  0x14   :  { %629 = vsyncadd [#allocation9], 4294966272  ;;  %v475_v0 = vld [vmem:[#allocation5 + $0x38] sm:$0xff]  ;;  %v474_v1 = vld [vmem:[#allocation5 + $0x30] sm:$0xff]  ;;  %s640_s26 = smov [#allocation10]   ;;  %s357_s29 = sshll.u32 %s718_s7, 4  ;;  %s358_s29 = int_to_ptr.hbm [resolvable:$true] %s357_s29 }
  0x15   :  { %161 = vmatpush.bf16.msra.mxu0 %v475_v0  ;;  %v483_v2 = vld [vmem:[#allocation7 + $0x38] sm:$0xff]  ;;  %v482_v3 = vld [vmem:[#allocation7 + $0x30] sm:$0xff]  ;;  %v473_v4 = vld [vmem:[#allocation5 + $0x28] sm:$0xff]  ;;  %s355_s27 = sshll.u32 %s640_s26, 4  ;;  %s356_s27 = int_to_ptr.vmem [resolvable:$true] %s355_s27 }
  0x16   :  { %248 = vmatpush.bf16.msra.mxu1 %v483_v2  ;;  %v481_v5 = vld [vmem:[#allocation7 + $0x28] sm:$0xff]  ;;  %v472_v6 = vld [vmem:[#allocation5 + $0x20] sm:$0xff]  ;;  %v471_v8 = vld [vmem:[#allocation5 + $0x18] sm:$0xff] }
  0x17   :  { %v480_v7 = vld [vmem:[#allocation7 + $0x20] sm:$0xff]  ;;  %v470_v9 = vld [vmem:[#allocation5 + $0x10] sm:$0xff]  ;;  %v469_v10 = vld [vmem:[#allocation5 + $0x8] sm:$0xff] }
  0x18   :  { %v468_v11 = vld [vmem:[#allocation5] sm:$0xff]  ;;  %v90_v12 = vld [vmem:[#allocation2] sm:$0xff]  ;;  %v91_v13 = vld [vmem:[#allocation2 + $0x8] sm:$0xff] }
  0x19   :  { %162 = vmatpush.bf16.msra.mxu0 %v474_v1  ;;  %v109_v14 = vpack.c.bf16 %v91_v13, %v90_v12  ;;  %v479_v15 = vld [vmem:[#allocation7 + $0x18] sm:$0xff]  ;;  %v478_v16 = vld [vmem:[#allocation7 + $0x10] sm:$0xff]  ;;  %v477_v17 = vld [vmem:[#allocation7 + $0x8] sm:$0xff] }
  0x1a   :  { %249 = vmatpush.bf16.msra.mxu1 %v482_v3  ;;  %v476_v18 = vld [vmem:[#allocation7] sm:$0xff]  ;;  %v491_v19 = vld [vmem:[#allocation8 + $0x38] sm:$0xff]  ;;  %v490_v20 = vld [vmem:[#allocation8 + $0x30] sm:$0xff] }
  0x1b   :  { %335 = vmatpush.bf16.msra.mxu2 %v491_v19  ;;  %v489_v21 = vld [vmem:[#allocation8 + $0x28] sm:$0xff]  ;;  %v488_v22 = vld [vmem:[#allocation8 + $0x20] sm:$0xff]  ;;  %v501_v24 = vld [vmem:[%s713_s2] ss:$0 sm:$0xff] }
  0x1c   :  { %v487_v33 = vld [vmem:[#allocation8 + $0x18] sm:$0xff]  ;;  %v486_v34 = vld [vmem:[#allocation8 + $0x10] sm:$0xff]  ;;  %v485_v35 = vld [vmem:[#allocation8 + $0x8] sm:$0xff] }
  0x1d   :  { %163 = vmatpush.bf16.msra.mxu0 %v473_v4  ;;  %v484_v36 = vld [vmem:[#allocation8] sm:$0xff]  ;;  %v502_v38 = vld [vmem:[%s715_s4] ss:$0 sm:$0xff] }
  0x1e   :  { %250 = vmatpush.bf16.msra.mxu1 %v481_v5  ;;  %v503_v47 = vld [vmem:[%s717_s6] ss:$0 sm:$0xff] }
  0x1f   :  { %336 = vmatpush.bf16.msra.mxu2 %v490_v20 }
  0x21   :  { %164 = vmatpush.bf16.msra.mxu0 %v472_v6 }
  0x22   :  { %251 = vmatpush.bf16.msra.mxu1 %v480_v7 }
  0x23   :  { %337 = vmatpush.bf16.msra.mxu2 %v489_v21 }
  0x25   :  { %165 = vmatpush.bf16.msra.mxu0 %v471_v8 }
  0x26   :  { %252 = vmatpush.bf16.msra.mxu1 %v479_v15 }
  0x27   :  { %338 = vmatpush.bf16.msra.mxu2 %v488_v22 }
  0x29   :  { %166 = vmatpush.bf16.msra.mxu0 %v470_v9 }
  0x2a   :  { %253 = vmatpush.bf16.msra.mxu1 %v478_v16 }
  0x2b   :  { %339 = vmatpush.bf16.msra.mxu2 %v487_v33 }
  0x2d   :  { %167 = vmatpush.bf16.msra.mxu0 %v469_v10 }
  0x2e   :  { %254 = vmatpush.bf16.msra.mxu1 %v477_v17 }
  0x2f   :  { %340 = vmatpush.bf16.msra.mxu2 %v486_v34 }
  0x31   :  { %168 = vmatpush.bf16.msra.mxu0 %v468_v11 }
  0x32   :  { %255 = vmatpush.bf16.msra.mxu1 %v476_v18 }
  0x33   :  { %341 = vmatpush.bf16.msra.mxu2 %v485_v35 }
  0x34   :  { %169 = vmatmul.bf16.vlgmr.msra.gmra.mxu0 %v109_v14 }
  0x37   :  { %342 = vmatpush.bf16.msra.mxu2 %v484_v36 }
  0xb1   :  { %v170_v23 = vpop.f32.mrf.mxu0 }
  0xb2   :  { %v171_v25 = vadd.f32 %v501_v24, %v170_v23 }
  0xb4   :  { %v175_v27 = vmul.f32 0.01, %v171_v25 }
  0xb6   :  { %v177_v30 = vmax.f32 %v171_v25, %v175_v27 }
  0xb9   :  { %v172_v26 = vpop.f32.mrf.mxu0 }
  0xba   :  { %v173_v28 = vadd.f32 %v501_v24, %v172_v26 }
  0xbc   :  { %v176_v29 = vmul.f32 0.01, %v173_v28 }
  0xbe   :  { %v178_v31 = vmax.f32 %v173_v28, %v176_v29 }
  0xc0   :  { %v196_v32 = vpack.c.bf16 %v178_v31, %v177_v30 }
  0xc2   :  { %256 = vmatmul.bf16.vlgmr.msra.gmra.mxu1 %v196_v32 }
 0x13f   :  { %v257_v37 = vpop.f32.mrf.mxu1 }
 0x140   :  { %v258_v39 = vadd.f32 %v502_v38, %v257_v37 }
 0x142   :  { %v262_v41 = vmul.f32 0.01, %v258_v39 }
 0x144   :  { %v264_v44 = vmax.f32 %v258_v39, %v262_v41 }
 0x147   :  { %v259_v40 = vpop.f32.mrf.mxu1 }
 0x148   :  { %v260_v42 = vadd.f32 %v502_v38, %v259_v40 }
 0x14a   :  { %v263_v43 = vmul.f32 0.01, %v260_v42 }
 0x14c   :  { %v265_v45 = vmax.f32 %v260_v42, %v263_v43 }
 0x14e   :  { %v283_v46 = vpack.c.bf16 %v265_v45, %v264_v44 }
 0x150   :  { %343 = vmatmul.bf16.vlgmr.msra.gmra.mxu2 %v283_v46 }
 0x1d3   :  { %v344_v48 = vpop.f32.mrf.mxu2 }
 0x1d4   :  { %v345_v49 = vadd.f32 %v503_v47, %v344_v48 }
 0x1d6   :  { %349 = vst [vmem:[#allocation10] sm:$0xff] %v345_v49 }
 0x1db   :  { %v346_v50 = vpop.f32.mrf.mxu2 }
 0x1dc   :  { %v347_v51 = vadd.f32 %v503_v47, %v346_v50 }
 0x1de   :  { %350 = vst [vmem:[#allocation10 + $0x8] sm:$0xff] %v347_v51 }
 0x1df   :  { %363 = dma.vmem_to_hbm [thread:$0]  %s356_s27, 256, %s358_s29, [#allocation4], %s636_s13, %s636_s13, %s637_s14  }
 0x1e0   :  { %630 = dma.done.wait [#allocation4], 256  }
 0x1e1   :  { %631 = vsyncadd [#allocation4], 4294967040 }
 0x1e2   :  { %368 = vsyncpa [#allocation3], 1 }
 0x1e3   :  { %369 = vsyncpa [#allocation6], 1 }
 0x1e4   :  { %370 = vsyncpa [#allocation9], 1 }
 0x1e5   :  { %371 = vsyncpa [#allocation4], 1 }

</bundles_post_ra>
